<compile_context>
chip_gen: v6e
topology: v6e:2x2x1
jax: 0.10.0
libtpu: 0.0.40
codegen_flags: <defaults>
</compile_context>

<pallas_src>
import jax
import jax.numpy as jnp
from jax.experimental import pallas as pl
from jax.experimental.pallas import tpu as pltpu


def _embed_kernel(patches_ref, w_ref, posb_ref, o_ref):
    # patches_ref: (TILE_M, K) bf16, w_ref: (K, Hp) bf16,
    # posb_ref:    (TILE_M, Hp) f32 (pos_emb + conv bias), o_ref: (TILE_M, Hp)
    acc = jnp.dot(patches_ref[...], w_ref[...],
                  preferred_element_type=jnp.float32)          # MXU, f32 acc
    o_ref[...] = (acc + posb_ref[...]).astype(o_ref.dtype)


def _choose_tile_m(B, P, target=512):
    """Pick an M tile that is sublane-aligned and compatible with the
    position-embedding periodicity (period = P rows)."""
    M = B * P
    if M <= target:
        return M                                   # one (or few) big tile(s)
    if P >= target:
        # largest multiple-of-8 divisor of P not exceeding `target`
        t = None
        for c in range(8, target + 1, 8):
            if P % c == 0:
                t = c
        # TODO(synk): if P has no multiple-of-8 divisor (e.g. P=196), pad the
        # patch dimension to a multiple of 8 instead of falling back.
        return t if t is not None else P
    # P < target < M: take m whole images per tile, m | B
    m = 1
    for c in range(1, B + 1):
        if B % c == 0 and P * c <= target:
            m = c
    return P * m


def vit_embeddings(x_nchw, conv_w, conv_b, pos_emb, patch_size):
    """x_nchw: [B, C, H, W]; conv_w: [hidden, C, ph, pw]; conv_b: [hidden];
    pos_emb: [1, P, hidden]. Returns [B, P, hidden] (== PyTorch forward)."""
    B, C, H, W = x_nchw.shape
    ph, pw = patch_size
    hidden = conv_w.shape[0]
    nph, npw = H // ph, W // pw
    P = nph * npw
    K = C * ph * pw
    M = B * P

    out_dtype = x_nchw.dtype
    compute_dtype = jnp.bfloat16

    # ---- glue: patchify (reshape/transpose), flattened over batch ----------
    # [B, C, nph, ph, npw, pw] -> [B, nph, npw, C, ph, pw] -> [B*P, K]
    patches = x_nchw.reshape(B, C, nph, ph, npw, pw)
    patches = patches.transpose(0, 2, 4, 1, 3, 5).reshape(M, K)
    patches = patches.astype(compute_dtype)
    # TODO(synk): this still materializes one [M, K] copy in HBM (now bf16, so
    # half the bytes); folding the per-patch gather into the BlockSpec / a
    # strided DMA would remove the round-trip entirely.

    # Conv-as-matmul weights + bias folded into the position embedding.
    w_mat = conv_w.reshape(hidden, K).T.astype(compute_dtype)          # (K, hidden)
    pos_plus_b = (pos_emb.reshape(P, hidden).astype(jnp.float32)
                  + conv_b.astype(jnp.float32)[None, :])               # (P, hidden)

    # Pad hidden to a multiple of 128 -> lane-dense output stores.
    Hp = ((hidden + 127) // 128) * 128
    if Hp != hidden:
        w_mat = jnp.pad(w_mat, ((0, 0), (0, Hp - hidden)))
        pos_plus_b = jnp.pad(pos_plus_b, ((0, 0), (0, Hp - hidden)))

    # ---- M tiling ----------------------------------------------------------
    tile_m = _choose_tile_m(B, P)
    assert M % tile_m == 0, "tile_m must divide B*P"
    assert tile_m % 8 == 0 or tile_m == M, "tile_m must be sublane-aligned"
    num_tiles = M // tile_m

    if tile_m % P == 0:
        # Tile spans whole images: pre-tile pos to tile_m rows, constant block.
        pos_arr = jnp.tile(pos_plus_b, (tile_m // P, 1))               # (tile_m, Hp)
        pos_index = lambda i: (0, 0)
    else:
        # Tile is a fraction of an image: pos block cycles with period P/tile_m.
        assert P % tile_m == 0, "tile_m must divide P in this branch"
        blocks_per_image = P // tile_m
        pos_arr = pos_plus_b                                           # (P, Hp)
        pos_index = lambda i: (i % blocks_per_image, 0)

    out_flat = pl.pallas_call(
        _embed_kernel,
        out_shape=jax.ShapeDtypeStruct((M, Hp), out_dtype),
        grid_spec=pltpu.PrefetchScalarGridSpec(
            num_scalar_prefetch=0,
            grid=(num_tiles,),
            in_specs=[
                pl.BlockSpec((tile_m, K), lambda i: (i, 0)),   # patches tile
                pl.BlockSpec((K, Hp), lambda i: (0, 0)),       # weights (resident)
                pl.BlockSpec((tile_m, Hp), pos_index),         # pos + bias
            ],
            out_specs=pl.BlockSpec((tile_m, Hp), lambda i: (i, 0)),
        ),
        compiler_params=pltpu.CompilerParams(
            dimension_semantics=("parallel",),
        ),
    )(patches, w_mat, pos_arr)

    out = out_flat[:, :hidden].reshape(B, P, hidden)

    # TODO(synk): nn.Dropout is identity in eval mode; training-mode stochastic
    # masking is not implemented here.
    return out


if __name__ == "__main__":
    # Small config consistent with the module: img=16x16, patch=4x4,
    # in_channels=4, hidden_size=32  ->  num_patches = 16, K = 64.
    B, C, Himg, Wimg = 2, 4, 16, 16
    ph = pw = 4
    hidden = 32
    P = (Himg // ph) * (Wimg // pw)
    K = C * ph * pw

    key = jax.random.PRNGKey(0)
    kx, kw, kb, kp = jax.random.split(key, 4)

    x = jax.random.normal(kx, (B, C, Himg, Wimg), dtype=jnp.float32)
    conv_w = jax.random.normal(kw, (hidden, C, ph, pw), dtype=jnp.float32) * 0.02
    conv_b = jax.random.normal(kb, (hidden,), dtype=jnp.float32) * 0.02
    # PyTorch __init__ uses zeros for the position embedding; keep a
    # deterministic non-zero value so the add path is actually exercised.
    pos_emb = jax.random.normal(kp, (1, P, hidden), dtype=jnp.float32) * 0.02

    out = vit_embeddings(x, conv_w, conv_b, pos_emb, (ph, pw))
    out = jax.block_until_ready(out)

    # Reference check in plain JAX f32 (conv-as-matmul). Kernel computes the
    # matmul in bf16 with f32 accumulation -> loosened tolerance.
    patches_ref = x.reshape(B, C, Himg // ph, ph, Wimg // pw, pw)
    patches_ref = patches_ref.transpose(0, 2, 4, 1, 3, 5).reshape(B, P, K)
    ref = patches_ref @ conv_w.reshape(hidden, K).T + conv_b + pos_emb
    assert out.shape == (B, P, hidden)
    assert jnp.allclose(out, ref, atol=1e-2, rtol=1e-2)

    print("KERNEL_OK")
</pallas_src>

<mosaic_0001>
module attributes {stable_mosaic.version = 11 : i64} {
  func.func @_embed_kernel(%arg0: i32, %arg1: memref<32x64xbf16, #tpu.memory_space<vmem>>, %arg2: memref<64x128xbf16, #tpu.memory_space<vmem>>, %arg3: memref<32x128xf32, #tpu.memory_space<vmem>>, %arg4: memref<32x128xf32, #tpu.memory_space<vmem>>) attributes {dimension_semantics = [#tpu.dimension_semantics<parallel>], iteration_bounds = array<i64: 1>, scalar_prefetch = 0 : i64, scratch_operands = 0 : i64, tpu.core_type = #tpu.core_type<tc>, window_params = [{transform_indices = @transform_0, window_bounds = array<i64: 32, 64>}, {pipeline_mode = #tpu.pipeline_mode<synchronous>, transform_indices = @transform_1, window_bounds = array<i64: 64, 128>}, {pipeline_mode = #tpu.pipeline_mode<synchronous>, transform_indices = @transform_2, window_bounds = array<i64: 32, 128>}, {transform_indices = @transform_3, window_bounds = array<i64: 32, 128>}]} {
    %c0 = arith.constant 0 : index
    %c0_0 = arith.constant 0 : index
    %0 = vector.load %arg1[%c0, %c0_0] : memref<32x64xbf16, #tpu.memory_space<vmem>>, vector<32x64xbf16>
    %c0_1 = arith.constant 0 : index
    %c0_2 = arith.constant 0 : index
    %1 = vector.load %arg2[%c0_1, %c0_2] : memref<64x128xbf16, #tpu.memory_space<vmem>>, vector<64x128xbf16>
    %cst = arith.constant dense<0.000000e+00> : vector<32x128xf32>
    %2 = tpu.matmul %0, %1, %cst {dimension_numbers = #tpu.dot_dimension_numbers<[1], [0], [0], [1], [0, 0, 1, 1], [], []>} : vector<32x64xbf16>, vector<64x128xbf16>, vector<32x128xf32> -> vector<32x128xf32>
    %c0_3 = arith.constant 0 : index
    %c0_4 = arith.constant 0 : index
    %3 = vector.load %arg3[%c0_3, %c0_4] : memref<32x128xf32, #tpu.memory_space<vmem>>, vector<32x128xf32>
    %4 = arith.addf %2, %3 : vector<32x128xf32>
    %c0_5 = arith.constant 0 : index
    %c0_6 = arith.constant 0 : index
    %5 = vector.load %arg4[%c0_5, %c0_6] : memref<32x128xf32, #tpu.memory_space<vmem>>, vector<32x128xf32>
    tpu.vector_store %arg4[%c0_5, %c0_6], %4 {strides = array<i32>} : memref<32x128xf32, #tpu.memory_space<vmem>>, vector<32x128xf32>,
    return
  }
  func.func @transform_0(%arg0: i32) -> (i32, i32) {
    %c0_i32 = arith.constant 0 : i32
    %c0_i32_0 = arith.constant 0 : i32
    return %arg0, %c0_i32 : i32, i32
  }
  func.func @transform_1(%arg0: i32) -> (i32, i32) {
    %c0_i32 = arith.constant 0 : i32
    %c0_i32_0 = arith.constant 0 : i32
    %c0_i32_1 = arith.constant 0 : i32
    return %c0_i32, %c0_i32_0 : i32, i32
  }
  func.func @transform_2(%arg0: i32) -> (i32, i32) {
    %c0_i32 = arith.constant 0 : i32
    %c0_i32_0 = arith.constant 0 : i32
    %c0_i32_1 = arith.constant 0 : i32
    return %c0_i32, %c0_i32_0 : i32, i32
  }
  func.func @transform_3(%arg0: i32) -> (i32, i32) {
    %c0_i32 = arith.constant 0 : i32
    %c0_i32_0 = arith.constant 0 : i32
    return %arg0, %c0_i32 : i32, i32
  }
}

</mosaic_0001>

<bundles_post_ra>
// kernel: tpu_custom_call.1
= control target key start
LH: loop header
LB: loop body
LE: loop exit
PB: predicated region body
PF: predicated region fallthrough
CT: control target
= control target key end

     0   :  { %8 = vsyncpa [#allocation3], 0  ;;  %s357_s0 = inlined_call_operand.hbm [shape: bf16[32,64], index: 0, kind: input, shape index: {}]   ;;  %s358_s1 = inlined_call_operand.hbm [shape: bf16[64,128], index: 1, kind: input, shape index: {}]   ;;  %s359_s2 = inlined_call_operand.hbm [shape: f32[32,128], index: 2, kind: input, shape index: {}]   ;;  %s360_s3 = inlined_call_operand.hbm [shape: f32[32,128], index: 3, kind: output, shape index: {}]  }
   0x1   :  { %9 = vsyncpa [#allocation6], 0 }
   0x2   :  { %10 = vsyncpa [#allocation4], 0  ;;  %s311_s12 = smov [#allocation5]   ;;  %s312_s14 = smov [#allocation2]  }
   0x3   :  { %s28_s13 = sshll.u32 %s311_s12, 4  ;;  %s16_s15 = sshll.u32 %s312_s14, 4  ;;  %s29_s13 = int_to_ptr.vmem [resolvable:$true] %s28_s13  ;;  %s17_s15 = int_to_ptr.vmem [resolvable:$true] %s16_s15 }
   0x4   :  { %s233_s16 = scalar_lea.vmem %s29_s13, 512  ;;  %p238_p1 = scmp.lt.s32.totalorder %s29_s13, %s29_s13 }
   0x5   :  { %p234_p0 = scmp.ne.s32.totalorder %s29_s13, %s233_s16  ;;  %p239_p2 = scmp.lt.s32.totalorder %s233_s16, %s233_s16 }
   0x7   :  { %p240_p3 = por %p239_p2, %p238_p1 }
   0x9   :  { %p241_p4 = pnand %p240_p3, %p234_p0 }
   0xb   :  { %244 = shalt.err (!%p241_p4)
}
   0xc   :  { %s313_s17 = smov 64   ;;  %s314_s18 = smov 4  }
   0xd   :  { %34 = dma.hbm_to_vmem [thread:$0]  %s358_s1, 512, %s29_s13, [#allocation6], %s313_s17, %s313_s17, %s314_s18  }
   0xe   :  { %s253_s21 = scalar_lea.vmem %s17_s15, 256  ;;  %p258_p6 = scmp.lt.s32.totalorder %s17_s15, %s17_s15 }
   0xf   :  { %p254_p5 = scmp.ne.s32.totalorder %s17_s15, %s253_s21  ;;  %p259_p7 = scmp.lt.s32.totalorder %s253_s21, %s253_s21 }
  0x11   :  { %p260_p8 = por %p259_p7, %p258_p6 }
  0x13   :  { %p261_p9 = pnand %p260_p8, %p254_p5 }
  0x15   :  { %264 = shalt.err (!%p261_p9)
}
  0x16   :  { %22 = dma.hbm_to_vmem [thread:$0]  %s357_s0, 256, %s17_s15, [#allocation3], %s313_s17, %s313_s17, %s314_s18  }
  0x17   :  { %s315_s24 = smov [#allocation7]  }
  0x18   :  { %s40_s25 = sshll.u32 %s315_s24, 4  ;;  %s41_s25 = int_to_ptr.vmem [resolvable:$true] %s40_s25 }
  0x19   :  { %s273_s26 = scalar_lea.vmem %s41_s25, 512  ;;  %p278_p11 = scmp.lt.s32.totalorder %s41_s25, %s41_s25 }
  0x1a   :  { %p274_p10 = scmp.ne.s32.totalorder %s41_s25, %s273_s26  ;;  %p279_p12 = scmp.lt.s32.totalorder %s273_s26, %s273_s26 }
  0x1c   :  { %p280_p13 = por %p279_p12, %p278_p11 }
  0x1e   :  { %p281_p0 = pnand %p280_p13, %p274_p10 }
  0x20   :  { %284 = shalt.err (!%p281_p0)
}
  0x21   :  { %s316_s1 = smov 128   ;;  %s317_s27 = smov 8  }
  0x22   :  { %46 = dma.hbm_to_vmem [thread:$0]  %s359_s2, 512, %s41_s25, [#allocation6], %s316_s1, %s316_s1, %s317_s27  }
  0x23   :  { %305 = dma.done.wait [#allocation3], 256  }
  0x24   :  { %306 = vsyncadd [#allocation3], 4294967040 }
  0x25   :  { %307 = dma.done.wait [#allocation6], 1024  }
  0x26   :  { %308 = vsyncadd [#allocation6], 4294966272  ;;  %v219_v0 = vld [vmem:[#allocation5 + $0x18] sm:$0xff]   ;;  %v220_v1 = vld [vmem:[#allocation5 + $0x10] sm:$0xff]   ;;  %vm107_vm0 = vcmask 523264   ;;  %s318_s0 = smov [#allocation8]  }
  0x27   :  { %199 = vmatprep.subr.bf16.mxu0 %v219_v0  ;;  %v221_v2 = vld [vmem:[#allocation5 + $0x8] sm:$0xff]   ;;  %v223_v3 = vld [vmem:[#allocation2] sm:$0xff]   ;;  %v222_v4 = vld [vmem:[#allocation5] sm:$0xff]   ;;  %s172_s2 = sshll.u32 %s318_s0, 4  ;;  %s173_s2 = int_to_ptr.vmem [resolvable:$true] %s172_s2 }
  0x28   :  { %200 = vmatpush3.bf16.msra.mxu0 %v219_v0  ;;  %207 = vmatprep.mubr.msk.bf16.mxu0 %vm107_vm0, %v223_v3  ;;  %v224_v5 = vld [vmem:[#allocation2 + $0x8] sm:$0xff]   ;;  %v71_v6 = vld [vmem:[#allocation7 + $0x10] sm:$0xff]  ;;  %v69_v8 = vld [vmem:[#allocation7] sm:$0xff]  ;;  %s285_s30 = scalar_lea.vmem %s173_s2, 512  ;;  %p290_p2 = scmp.lt.s32.totalorder %s173_s2, %s173_s2 }
  0x29   :  { %201 = vmatprep.subr.bf16.mxu0 %v220_v1  ;;  %v72_v11 = vld [vmem:[#allocation7 + $0x18] sm:$0xff]  ;;  %v70_v14 = vld [vmem:[#allocation7 + $0x8] sm:$0xff]  ;;  %p286_p1 = scmp.ne.s32.totalorder %s173_s2, %s285_s30  ;;  %p291_p3 = scmp.lt.s32.totalorder %s285_s30, %s285_s30 }
  0x2b   :  { %p292_p4 = por %p291_p3, %p290_p2 }
  0x2c   :  { %202 = vmatpush3.bf16.msra.mxu0 %v220_v1 }
  0x2d   :  { %203 = vmatprep.subr.bf16.mxu0 %v221_v2  ;;  %p293_p5 = pnand %p292_p4, %p286_p1 }
  0x30   :  { %204 = vmatpush3.bf16.msra.mxu0 %v221_v2 }
  0x31   :  { %205 = vmatprep.subr.bf16.mxu0 %v222_v4 }
  0x34   :  { %206 = vmatpush3.bf16.msra.mxu0 %v222_v4 }
  0x37   :  { %208 = vmatmul.mubr.msk.bf16.vlgmr.msra.gmra.mxu0 %vm107_vm0, %v224_v5 }
  0xf7   :  { %v209_v7 = vpop.f32.mrf.mxu0 }
  0xf8   :  { %v157_v9 = vadd.f32 %v209_v7, %v71_v6 }
  0xf9   :  { %v148_v10 = vpop.f32.mrf.mxu0 }
  0xfa   :  { %165 = vst [vmem:[#allocation8 + $0x10] sm:$0xff] %v157_v9  ;;  %v149_v12 = vadd.f32 %v148_v10, %v69_v8 }
  0xfb   :  { %v210_v13 = vpop.f32.mrf.mxu0 }
  0xfc   :  { %163 = vst [vmem:[#allocation8] sm:$0xff] %v149_v12  ;;  %v160_v15 = vadd.f32 %v210_v13, %v72_v11 }
  0xfd   :  { %v151_v16 = vpop.f32.mrf.mxu0 }
  0xfe   :  { %166 = vst [vmem:[#allocation8 + $0x18] sm:$0xff] %v160_v15  ;;  %v152_v17 = vadd.f32 %v151_v16, %v70_v14 }
 0x100   :  { %164 = vst [vmem:[#allocation8 + $0x8] sm:$0xff] %v152_v17 }
 0x101   :  { %296 = shalt.err (!%p293_p5)
}
 0x102   :  { %178 = dma.vmem_to_hbm [thread:$0]  %s173_s2, 512, %s360_s3, [#allocation4], %s316_s1, %s316_s1, %s317_s27  }
 0x103   :  { %309 = dma.done.wait [#allocation4], 512  }
 0x104   :  { %310 = vsyncadd [#allocation4], 4294966784 }
 0x105   :  { %182 = vsyncpa [#allocation3], 1 }
 0x106   :  { %183 = vsyncpa [#allocation6], 1 }
 0x107   :  { %184 = vsyncpa [#allocation4], 1 }

</bundles_post_ra>
